<compile_context>
chip_gen: v7x
topology: tpu7x:2x2x1
jax: 0.10.0
libtpu: 0.0.40
codegen_flags: <defaults>
</compile_context>

<pallas_src>
import math
from functools import partial

import jax
import jax.numpy as jnp
from jax.experimental import pallas as pl
from jax.experimental.pallas import tpu as pltpu


# --------------------------------------------------------------------------- #
# PE table (identical to the PyTorch __init__)
# --------------------------------------------------------------------------- #
def _build_pe_table(max_seq_len: int, d_model: int) -> jnp.ndarray:
    assert d_model % 2 == 0, "d_model must be even (same assumption as the PyTorch module)"
    position = jnp.arange(0, max_seq_len, dtype=jnp.float32)[:, None]             # (L, 1)
    div_term = jnp.exp(
        jnp.arange(0, d_model, 2, dtype=jnp.float32) * (-math.log(10000.0) / d_model)
    )                                                                              # (D/2,)
    angles = position * div_term                                                   # (L, D/2)
    pe = jnp.zeros((max_seq_len, d_model), dtype=jnp.float32)
    pe = pe.at[:, 0::2].set(jnp.sin(angles))
    pe = pe.at[:, 1::2].set(jnp.cos(angles))
    return pe                                                                      # (L, D)


# --------------------------------------------------------------------------- #
# Kernel
# --------------------------------------------------------------------------- #
def _pos_enc_kernel(x_ref, pe_ref, o_ref, *, scale: float):
    # x_ref: (TB, TC) tile of the lane-dense (B, S*D) view
    # pe_ref: (1, TC) tile of the flattened pe table (broadcast over sublanes)
    x = x_ref[...].astype(jnp.float32)
    pe = pe_ref[...].astype(jnp.float32)
    o_ref[...] = (x * scale + pe).astype(o_ref.dtype)


# --------------------------------------------------------------------------- #
# Tiling helpers
# --------------------------------------------------------------------------- #
def _sublane_quantum(dtype) -> int:
    """Sublane packing quantum per element size (f32: 8, bf16: 16, int8/fp8: 32)."""
    return {4: 8, 2: 16, 1: 32}.get(jnp.dtype(dtype).itemsize, 8)


def _pick_tile(n: int, quantum: int, max_elems: int) -> int:
    """Tile size for a dim of length n.

    Returns the full dim if it fits the budget; otherwise a multiple of
    `quantum` <= budget, preferring an exact divisor of n (no ragged block).
    Never returns more than max(quantum, budget) elements — the grid uses
    pl.cdiv so a ragged last block is fine.
    """
    if n <= max_elems:
        return n
    limit = max(quantum, (max_elems // quantum) * quantum)
    if limit >= n:
        return n
    best = 0
    t = quantum
    while t <= limit:
        if n % t == 0:
            best = t
        t += quantum
    return best if best > 0 else limit


# --------------------------------------------------------------------------- #
# Wrapper
# --------------------------------------------------------------------------- #
def positional_encoder_2d(x2: jnp.ndarray, pe2: jnp.ndarray, d_model: int,
                          *, tile_budget_bytes: int = 2 << 20) -> jnp.ndarray:
    """Core pallas_call on the lane-dense views. x2: (B, C); pe2: (1, C)."""
    B, C = x2.shape
    itemsize = jnp.dtype(x2.dtype).itemsize
    target_elems = max(128, tile_budget_bytes // itemsize)
    quantum_b = _sublane_quantum(x2.dtype)

    # Lane-dense column tile first (multiple of 128), then batch rows.
    TC = _pick_tile(C, 128, target_elems)
    TB = _pick_tile(B, quantum_b, max(1, target_elems // TC))
    n_c = pl.cdiv(C, TC)
    n_b = pl.cdiv(B, TB)

    # Megacore: make sure a non-trivial problem produces >= 2 parallel grid
    # steps so both v7x TensorCores get work.
    total_bytes = B * C * itemsize
    if n_c * n_b < 2 and total_bytes >= (1 << 20):
        if C >= 2 * 128:
            TC = max(128, ((TC // 2) // 128) * 128)
            n_c = pl.cdiv(C, TC)
        elif B > quantum_b:
            TB = max(quantum_b, ((TB // 2) // quantum_b) * quantum_b)
            n_b = pl.cdiv(B, TB)

    # Explicit VMEM budget: double-buffered x-in + out tiles + double-buffered
    # pe tile (which pads to 8 sublanes in VMEM).  1.5x slack, >= 16 MiB so the
    # v5e default scoped limit is lifted, <= 48 MiB to stay under v7x's 64 MiB
    # physical VMEM.
    tile_bytes = TB * TC * itemsize
    pe_block_bytes = 8 * TC * itemsize
    vmem_needed = 2 * (2 * tile_bytes) + 2 * pe_block_bytes
    vmem_limit = min(max(int(1.5 * vmem_needed), 16 << 20), 48 << 20)
    vmem_limit = max(vmem_limit, vmem_needed)   # never below the real need

    scale = float(math.sqrt(d_model))
    kernel = partial(_pos_enc_kernel, scale=scale)

    return pl.pallas_call(
        kernel,
        out_shape=jax.ShapeDtypeStruct((B, C), x2.dtype),
        grid_spec=pltpu.PrefetchScalarGridSpec(
            num_scalar_prefetch=0,
            # Batch innermost: pe block index is constant across consecutive
            # steps -> Pallas skips re-DMA of the table for every batch row.
            grid=(n_c, n_b),
            in_specs=[
                pl.BlockSpec((TB, TC), lambda c, b: (b, c)),   # x tile
                pl.BlockSpec((1, TC), lambda c, b: (0, c)),    # pe tile (batch-invariant)
            ],
            out_specs=pl.BlockSpec((TB, TC), lambda c, b: (b, c)),
        ),
        compiler_params=pltpu.CompilerParams(
            # Both axes independent -> shardable across v7x's two TensorCores.
            dimension_semantics=("parallel", "parallel"),
            vmem_limit_bytes=vmem_limit,
        ),
    )(x2, pe2)


class PositionalEncoder:
    """JAX/Pallas equivalent of the PyTorch PositionalEncoder module."""

    def __init__(self, d_model: int, max_seq_len: int = 200):
        self.d_model = d_model
        self.max_seq_len = max_seq_len
        self.pe = _build_pe_table(max_seq_len, d_model)    # (L, D) float32
        # Hoisted pe prep: cache the flattened / dtype-cast table per (S, dtype)
        # so repeated calls don't emit a fresh XLA slice+convert each time.
        self._pe_cache = {}

    def _pe_view(self, seq_len: int, dtype) -> jnp.ndarray:
        key = (seq_len, jnp.dtype(dtype).name)
        pe2 = self._pe_cache.get(key)
        if pe2 is None:
            pe2 = jnp.asarray(
                self.pe[:seq_len, :].reshape(1, seq_len * self.d_model), dtype=dtype
            )
            pe2 = jax.block_until_ready(pe2)
            self._pe_cache[key] = pe2
        return pe2

    def __call__(self, x: jnp.ndarray) -> jnp.ndarray:
        B, S, D = x.shape
        assert D == self.d_model, f"last dim {D} != d_model {self.d_model}"
        assert S <= self.max_seq_len, f"seq_len {S} exceeds max_seq_len {self.max_seq_len}"
        pe2 = self._pe_view(S, x.dtype)
        out2 = positional_encoder_2d(x.reshape(B, S * D), pe2, self.d_model)
        return out2.reshape(B, S, D)


# --------------------------------------------------------------------------- #
# Demo / correctness check
# --------------------------------------------------------------------------- #
if __name__ == "__main__":
    # Small shapes consistent with the module: batch=2, seq=8, d_model=32.
    batch, seq, d_model = 2, 8, 32
    max_seq_len = 200

    key = jax.random.PRNGKey(0)
    x = jax.random.normal(key, (batch, seq, d_model), dtype=jnp.float32)

    enc = PositionalEncoder(d_model, max_seq_len)
    out = enc(x)
    out = jax.block_until_ready(out)

    # Reference check (plain JAX).
    ref = x * math.sqrt(d_model) + enc.pe[:seq, :][None, :, :]
    assert out.shape == (batch, seq, d_model)
    assert jnp.allclose(out, ref, atol=1e-5, rtol=1e-5)

    print("KERNEL_OK")
</pallas_src>

<mosaic_0001>
module attributes {stable_mosaic.version = 11 : i64} {
  func.func @_pos_enc_kernel(%arg0: i32, %arg1: i32, %arg2: memref<2x256xf32, #tpu.memory_space<vmem>>, %arg3: memref<1x256xf32, #tpu.memory_space<vmem>>, %arg4: memref<2x256xf32, #tpu.memory_space<vmem>>) attributes {dimension_semantics = [#tpu.dimension_semantics<parallel>, #tpu.dimension_semantics<parallel>], iteration_bounds = array<i64: 1, 1>, scalar_prefetch = 0 : i64, scratch_operands = 0 : i64, tpu.core_type = #tpu.core_type<tc>, window_params = [{transform_indices = @transform_0, window_bounds = array<i64: 2, 256>}, {transform_indices = @transform_1, window_bounds = array<i64: 1, 256>}, {transform_indices = @transform_2, window_bounds = array<i64: 2, 256>}]} {
    %c0 = arith.constant 0 : index
    %c0_0 = arith.constant 0 : index
    %0 = vector.load %arg2[%c0, %c0_0] : memref<2x256xf32, #tpu.memory_space<vmem>>, vector<2x256xf32>
    %c0_1 = arith.constant 0 : index
    %c0_2 = arith.constant 0 : index
    %1 = vector.load %arg3[%c0_1, %c0_2] : memref<1x256xf32, #tpu.memory_space<vmem>>, vector<1x256xf32>
    %cst = arith.constant 5.65685415 : f32
    %2 = vector.broadcast %cst : f32 to vector<2x256xf32>
    %3 = arith.mulf %0, %2 : vector<2x256xf32>
    %4 = vector.broadcast %1 : vector<1x256xf32> to vector<2x256xf32>
    %5 = arith.addf %3, %4 : vector<2x256xf32>
    %c0_3 = arith.constant 0 : index
    %c0_4 = arith.constant 0 : index
    %6 = vector.load %arg4[%c0_3, %c0_4] : memref<2x256xf32, #tpu.memory_space<vmem>>, vector<2x256xf32>
    tpu.vector_store %arg4[%c0_3, %c0_4], %5 {strides = array<i32>} : memref<2x256xf32, #tpu.memory_space<vmem>>, vector<2x256xf32>,
    return
  }
  func.func @transform_0(%arg0: i32, %arg1: i32) -> (i32, i32) {
    %c0_i32 = arith.constant 0 : i32
    return %arg1, %arg0 : i32, i32
  }
  func.func @transform_1(%arg0: i32, %arg1: i32) -> (i32, i32) {
    %c0_i32 = arith.constant 0 : i32
    %c0_i32_0 = arith.constant 0 : i32
    return %c0_i32, %arg0 : i32, i32
  }
  func.func @transform_2(%arg0: i32, %arg1: i32) -> (i32, i32) {
    %c0_i32 = arith.constant 0 : i32
    return %arg1, %arg0 : i32, i32
  }
}

</mosaic_0001>

<bundles_post_ra>
// kernel: tpu_custom_call.1
= control target key start
LH: loop header
LB: loop body
LE: loop exit
PB: predicated region body
PF: predicated region fallthrough
CT: control target
= control target key end

     0   :  { %7 = vsyncpa [#allocation3], 0  ;;  %s158_s0 = inlined_call_operand.hbm [shape: f32[2,256], index: 0, kind: input, shape index: {}]   ;;  %s159_s1 = inlined_call_operand.vmem [shape: f32[1,256], index: 1, kind: input, shape index: {}]   ;;  %s160_s2 = inlined_call_operand.hbm [shape: f32[2,256], index: 2, kind: output, shape index: {}]  }
   0x1   :  { %8 = vsyncpa [#allocation4], 0  ;;  %s113_s9 = smov [#allocation2]   ;;  %s65_s13 = scalar_lea.hbm %s158_s0, 64 }
   0x2   :  { %s15_s10 = sshll.u32 %s113_s9, 4  ;;  %p66_p0 = scmp.ne.s32.totalorder %s158_s0, %s65_s13  ;;  %s16_s10 = int_to_ptr.vmem [resolvable:$true] %s15_s10 }
   0x3   :  { %p69_p1 = scmp.lt.u32.totalorder %s65_s13, %s158_s0 }
   0x5   :  { %p71_p2 = pnand %p69_p1, %p66_p0 }
   0x7   :  { %74 = shalt.err (!%p71_p2)
}
   0x8   :  { %s75_s18 = scalar_lea.vmem %s16_s10, 64  ;;  %p80_p4 = scmp.lt.s32.totalorder %s16_s10, %s16_s10 }
   0x9   :  { %p76_p3 = scmp.ne.s32.totalorder %s16_s10, %s75_s18  ;;  %p81_p5 = scmp.lt.s32.totalorder %s75_s18, %s75_s18 }
   0xb   :  { %p82_p6 = por %p81_p5, %p80_p4 }
   0xd   :  { %p83_p7 = pnand %p82_p6, %p76_p3 }
   0xf   :  { %86 = shalt.err (!%p83_p7)
}
  0x10   :  { %18 = dma.hbm_to_vmem [thread:$0]  %s158_s0, 64, %s16_s10, [#allocation3]  }
  0x11   :  { %109 = dma.done.wait [#allocation3], 64  }
  0x12   :  { %110 = vsyncadd [#allocation3], 4294967232  ;;  %v28_v0 = vlaneseq  ;;  %v114_v1 = vmov 1983009808   ;;  %v24_v7 = vld [vmem:[#allocation2] sm:$0xf] }
  0x13   :  { %v38_v2 = vunpack.c.l.s4 %v114_v1  ;;  %v25_v8 = vld [vmem:[%s159_s1] sm:$0x3]  ;;  %v26_v12 = vmul.f32 5.656854, %v24_v7  ;;  %s115_s0 = smov [#allocation5]  }
  0x14   :  { %v29_v3 = vshrl.u32 %v28_v0, 7  ;;  %s53_s23 = sshll.u32 %s115_s0, 4  ;;  %s54_s23 = int_to_ptr.vmem [resolvable:$true] %s53_s23 }
  0x15   :  { %v39_v6 = vunpack.c.0.s8 %v38_v2  ;;  %s87_s24 = scalar_lea.vmem %s54_s23, 64  ;;  %p92_p9 = scmp.lt.s32.totalorder %s54_s23, %s54_s23 }
  0x16   :  { %v30_v4 = vsub.s32 0, %v29_v3  ;;  %v34_v5 = vsub.s32 1, %v29_v3  ;;  %p88_p8 = scmp.ne.s32.totalorder %s54_s23, %s87_s24  ;;  %p93_p10 = scmp.lt.s32.totalorder %s87_s24, %s87_s24 }
  0x17   :  { %v42_v11 = vsub.s32 %v39_v6, %v29_v3 }
  0x18   :  { %v31_v9 = vrot.slane %v25_v8, %v30_v4  ;;  %v35_v10 = vrot.slane %v25_v8, %v34_v5  ;;  %p94_p11 = por %p93_p10, %p92_p9 }
  0x1a   :  { %v36_v13 = vcombine.low %v31_v9, %v35_v10  ;;  %p95_p12 = pnand %p94_p11, %p88_p8 }
  0x1c   :  { %v43_v14 = vrot.slane %v36_v13, %v42_v11 }
  0x1e   :  { %v45_v15 = vadd.f32 %v43_v14, %v26_v12 }
  0x20   :  { %46 = vst [vmem:[#allocation5] sm:$0xf] %v45_v15 }
  0x21   :  { %98 = shalt.err (!%p95_p12)
}
  0x22   :  { %s99_s26 = scalar_lea.hbm %s160_s2, 64 }
  0x23   :  { %p100_p13 = scmp.ne.s32.totalorder %s160_s2, %s99_s26  ;;  %p103_p0 = scmp.lt.u32.totalorder %s99_s26, %s160_s2 }
  0x25   :  { %p105_p1 = pnand %p103_p0, %p100_p13 }
  0x27   :  { %108 = shalt.err (!%p105_p1)
}
  0x28   :  { %56 = dma.vmem_to_hbm [thread:$0]  %s54_s23, 64, %s160_s2, [#allocation4]  }
  0x29   :  { %111 = dma.done.wait [#allocation4], 64  }
  0x2a   :  { %112 = vsyncadd [#allocation4], 4294967232 }
  0x2b   :  { %60 = vsyncpa [#allocation3], 1 }
  0x2c   :  { %61 = vsyncpa [#allocation4], 1 }

</bundles_post_ra>
